<compile_context>
chip_gen: v7x
topology: tpu7x:2x2x1
jax: 0.10.0
libtpu: 0.0.40
codegen_flags: <defaults>
</compile_context>

<pallas_src>
import math

import jax
import jax.numpy as jnp
from jax.experimental import pallas as pl
from jax.experimental.pallas import tpu as pltpu


# ---- module hyper-parameters (LinearAttention defaults) ---------------------
DIM = 8          # channel dim of the module
HEADS = 4
DIM_HEAD = 32
HIDDEN = HEADS * DIM_HEAD          # 128
SCALE = DIM_HEAD ** (-0.5)
SEQ = 16                           # sequence length n
BATCH = 2
EPS = 1e-12                        # F.normalize eps


def linear_attention_kernel(x_ref, wqkv_ref, wout_ref, bg_ref, mask_ref, o_ref):
    """Whole problem in one invocation, channels-last layout.

    x_ref    : (B*N, DIM)        rows = (batch, position), channels on lanes
    wqkv_ref : (DIM, 3*HIDDEN)   to_qkv 1x1 conv weight, transposed
    wout_ref : (HIDDEN, DIM)     to_out conv weight, transposed
    bg_ref   : (2, DIM)          row 0 = conv bias, row 1 = g * sqrt(DIM)
    mask_ref : (HIDDEN, HIDDEN)  block-diagonal head mask (f32 0/1)
    o_ref    : (B*N, DIM)
    """
    x = x_ref[...]                                              # (32, 8)

    # to_qkv: 1x1 conv == channel matmul; one full-batch matmul, 384 lanes
    qkv = jnp.dot(x, wqkv_ref[...],
                  preferred_element_type=jnp.float32)           # (32, 384)

    q = qkv[:, :HIDDEN]                                         # (32, 128)
    k = qkv[:, HIDDEN:2 * HIDDEN]                               # (32, 128)
    v = qkv[:, 2 * HIDDEN:]                                     # (32, 128)
    S = mask_ref[...]                                           # (128, 128)

    # ---- q: softmax over dim_head (32-lane segments per head), then * scale.
    # A row-global max is an equally valid stabilizer for every segment.
    m_q = jnp.max(q, axis=-1, keepdims=True)                    # (32, 1)
    e_q = jnp.exp(q - m_q)
    # per-head sums broadcast to every lane of that head via one MXU matmul
    seg_sum = jnp.dot(e_q, S, preferred_element_type=jnp.float32)
    q_s = e_q * pl.reciprocal(seg_sum) * SCALE                  # (32, 128)

    # ---- per batch element: k softmax over n + all-head masked context.
    # B=2 is fully unrolled; every matmul is full 128-lane width.
    outs = []
    for b in range(BATCH):
        r0 = b * SEQ
        kb = k[r0:r0 + SEQ, :]                                  # (16, 128)
        vb = v[r0:r0 + SEQ, :]                                  # (16, 128)
        qb = q_s[r0:r0 + SEQ, :]                                # (16, 128)

        m_k = jnp.max(kb, axis=0, keepdims=True)                # (1, 128)
        e_k = jnp.exp(kb - m_k)
        s_k = jnp.sum(e_k, axis=0, keepdims=True)               # (1, 128)
        k_s = e_k * pl.reciprocal(s_k)                          # (16, 128)

        # context for all heads at once; cross-head blocks zeroed by S
        ctx = jnp.dot(k_s.T, vb,
                      preferred_element_type=jnp.float32)       # (128, 128)
        ctx = ctx * S
        outs.append(jnp.dot(qb, ctx,
                            preferred_element_type=jnp.float32))  # (16, 128)

    out = jnp.concatenate(outs, axis=0)                         # (32, 128)

    # ---- to_out conv (with bias)
    proj = jnp.dot(out, wout_ref[...],
                   preferred_element_type=jnp.float32)          # (32, 8)
    proj = proj + bg_ref[0:1, :]

    # ---- RMSNorm over channels: F.normalize(., dim=channels) * (g * sqrt(DIM))
    sumsq = jnp.sum(proj * proj, axis=-1, keepdims=True)        # (32, 1)
    inv = jax.lax.rsqrt(jnp.maximum(sumsq, EPS * EPS))          # EUP rsqrt
    o_ref[...] = proj * inv * bg_ref[1:2, :]


def linear_attention(x, w_qkv, w_out, b_out, g):
    b, c, n = x.shape
    assert b == BATCH and c == DIM and n == SEQ

    # channels-last, batch-fused layout (HIDDEN on the lane axis inside)
    x_flat = jnp.transpose(x, (0, 2, 1)).reshape(b * n, c)      # (32, 8)
    w_qkv_t = w_qkv.T                                           # (8, 384)
    w_out_t = w_out.T                                           # (128, 8)
    bg = jnp.stack([b_out, g * (DIM ** 0.5)], axis=0)           # (2, 8)

    # block-diagonal head mask: 1 where both lanes belong to the same head
    head_id = jnp.arange(HIDDEN, dtype=jnp.int32) // DIM_HEAD
    seg_mask = (head_id[:, None] == head_id[None, :]).astype(jnp.float32)

    out_flat = pl.pallas_call(
        linear_attention_kernel,
        out_shape=jax.ShapeDtypeStruct((b * n, c), jnp.float32),
        grid_spec=pltpu.PrefetchScalarGridSpec(
            num_scalar_prefetch=0,
            grid=(1,),
            in_specs=[
                pl.BlockSpec((b * n, c), lambda i: (0, 0)),
                pl.BlockSpec((c, 3 * HIDDEN), lambda i: (0, 0)),
                pl.BlockSpec((HIDDEN, c), lambda i: (0, 0)),
                pl.BlockSpec((2, c), lambda i: (0, 0)),
                pl.BlockSpec((HIDDEN, HIDDEN), lambda i: (0, 0)),
            ],
            out_specs=pl.BlockSpec((b * n, c), lambda i: (0, 0)),
        ),
        compiler_params=pltpu.CompilerParams(
            dimension_semantics=("arbitrary",)),
    )(x_flat, w_qkv_t, w_out_t, bg, seg_mask)

    return jnp.transpose(out_flat.reshape(b, n, c), (0, 2, 1))  # (B, DIM, N)


def reference(x, w_qkv, w_out, b_out, g):
    b, c, n = x.shape
    qkv = jnp.einsum('oc,bcn->bon', w_qkv, x)
    q, k, v = jnp.split(qkv, 3, axis=1)
    resh = lambda t: t.reshape(b, HEADS, DIM_HEAD, n)
    q, k, v = resh(q), resh(k), resh(v)
    q = jax.nn.softmax(q, axis=-2) * SCALE
    k = jax.nn.softmax(k, axis=-1)
    context = jnp.einsum('bhdn,bhen->bhde', k, v)
    out = jnp.einsum('bhde,bhdn->bhen', context, q)
    out = out.reshape(b, HIDDEN, n)
    out = jnp.einsum('oc,bcn->bon', w_out, out) + b_out[None, :, None]
    norm = jnp.sqrt(jnp.sum(out * out, axis=1, keepdims=True))
    normed = out / jnp.maximum(norm, EPS)
    return normed * g[None, :, None] * (c ** 0.5)


if __name__ == "__main__":
    key = jax.random.PRNGKey(0)
    kx, kq, ko, kb = jax.random.split(key, 4)

    x = jax.random.normal(kx, (BATCH, DIM, SEQ), dtype=jnp.float32)

    # Deterministic parameter init (shapes from the module's __init__).
    # to_qkv: Conv1d(DIM, 3*HIDDEN, 1, bias=False) -> weight (3*HIDDEN, DIM)
    w_qkv = jax.random.normal(kq, (3 * HIDDEN, DIM), dtype=jnp.float32) * (1.0 / math.sqrt(DIM))
    # to_out conv: Conv1d(HIDDEN, DIM, 1) -> weight (DIM, HIDDEN), bias (DIM,)
    w_out = jax.random.normal(ko, (DIM, HIDDEN), dtype=jnp.float32) * (1.0 / math.sqrt(HIDDEN))
    b_out = jax.random.normal(kb, (DIM,), dtype=jnp.float32) * 0.01
    # RMSNorm g initialized to ones (as in module)
    g = jnp.ones((DIM,), dtype=jnp.float32)

    out = jax.block_until_ready(linear_attention(x, w_qkv, w_out, b_out, g))
    ref = reference(x, w_qkv, w_out, b_out, g)

    assert out.shape == (BATCH, DIM, SEQ)
    assert jnp.allclose(out, ref, atol=1e-4, rtol=1e-4), "mismatch vs reference"

    print("KERNEL_OK")
</pallas_src>

<mosaic_0001>
module attributes {stable_mosaic.version = 11 : i64} {
  func.func @linear_attention_kernel(%arg0: i32, %arg1: memref<32x8xf32, #tpu.memory_space<vmem>>, %arg2: memref<8x384xf32, #tpu.memory_space<vmem>>, %arg3: memref<128x8xf32, #tpu.memory_space<vmem>>, %arg4: memref<2x8xf32, #tpu.memory_space<vmem>>, %arg5: memref<128x128xf32, #tpu.memory_space<vmem>>, %arg6: memref<32x8xf32, #tpu.memory_space<vmem>>) attributes {dimension_semantics = [#tpu.dimension_semantics<arbitrary>], iteration_bounds = array<i64: 1>, scalar_prefetch = 0 : i64, scratch_operands = 0 : i64, tpu.core_type = #tpu.core_type<tc>, window_params = [{pipeline_mode = #tpu.pipeline_mode<synchronous>, transform_indices = @transform_0, window_bounds = array<i64: 32, 8>}, {pipeline_mode = #tpu.pipeline_mode<synchronous>, transform_indices = @transform_1, window_bounds = array<i64: 8, 384>}, {pipeline_mode = #tpu.pipeline_mode<synchronous>, transform_indices = @transform_2, window_bounds = array<i64: 128, 8>}, {pipeline_mode = #tpu.pipeline_mode<synchronous>, transform_indices = @transform_3, window_bounds = array<i64: 2, 8>}, {pipeline_mode = #tpu.pipeline_mode<synchronous>, transform_indices = @transform_4, window_bounds = array<i64: 128, 128>}, {pipeline_mode = #tpu.pipeline_mode<synchronous>, transform_indices = @transform_5, window_bounds = array<i64: 32, 8>}]} {
    %c0 = arith.constant 0 : index
    %c0_0 = arith.constant 0 : index
    %0 = vector.load %arg1[%c0, %c0_0] : memref<32x8xf32, #tpu.memory_space<vmem>>, vector<32x8xf32>
    %c0_1 = arith.constant 0 : index
    %c0_2 = arith.constant 0 : index
    %1 = vector.load %arg2[%c0_1, %c0_2] : memref<8x384xf32, #tpu.memory_space<vmem>>, vector<8x384xf32>
    %cst = arith.constant dense<0.000000e+00> : vector<32x384xf32>
    %2 = tpu.matmul %0, %1, %cst {dimension_numbers = #tpu.dot_dimension_numbers<[1], [0], [0], [1], [0, 0, 1, 1], [], []>} : vector<32x8xf32>, vector<8x384xf32>, vector<32x384xf32> -> vector<32x384xf32>
    %3 = vector.extract_strided_slice %2 {offsets = [0, 0], sizes = [32, 128], strides = [1, 1]} : vector<32x384xf32> to vector<32x128xf32>
    %4 = vector.extract_strided_slice %2 {offsets = [0, 128], sizes = [32, 128], strides = [1, 1]} : vector<32x384xf32> to vector<32x128xf32>
    %5 = vector.extract_strided_slice %2 {offsets = [0, 256], sizes = [32, 128], strides = [1, 1]} : vector<32x384xf32> to vector<32x128xf32>
    %c0_3 = arith.constant 0 : index
    %c0_4 = arith.constant 0 : index
    %6 = vector.load %arg5[%c0_3, %c0_4] : memref<128x128xf32, #tpu.memory_space<vmem>>, vector<128x128xf32>
    %cst_5 = arith.constant dense<0xFF800000> : vector<32xf32>
    %7 = vector.multi_reduction <maximumf>, %3, %cst_5 [1] : vector<32x128xf32> to vector<32xf32>
    %8 = vector.shape_cast %7 : vector<32xf32> to vector<32x1xf32>
    %9 = vector.broadcast %8 : vector<32x1xf32> to vector<32x128xf32>
    %10 = arith.subf %3, %9 : vector<32x128xf32>
    %11 = math.exp %10 : vector<32x128xf32>
    %cst_6 = arith.constant dense<0.000000e+00> : vector<32x128xf32>
    %12 = tpu.matmul %11, %6, %cst_6 {dimension_numbers = #tpu.dot_dimension_numbers<[1], [0], [0], [1], [0, 0, 1, 1], [], []>} : vector<32x128xf32>, vector<128x128xf32>, vector<32x128xf32> -> vector<32x128xf32>
    %13 = tpu.reciprocal %12 : vector<32x128xf32> -> vector<32x128xf32>
    %14 = arith.mulf %11, %13 : vector<32x128xf32>
    %cst_7 = arith.constant 0.176776692 : f32
    %15 = vector.broadcast %cst_7 : f32 to vector<32x128xf32>
    %16 = arith.mulf %14, %15 : vector<32x128xf32>
    %17 = vector.extract_strided_slice %4 {offsets = [0, 0], sizes = [16, 128], strides = [1, 1]} : vector<32x128xf32> to vector<16x128xf32>
    %18 = vector.extract_strided_slice %5 {offsets = [0, 0], sizes = [16, 128], strides = [1, 1]} : vector<32x128xf32> to vector<16x128xf32>
    %19 = vector.extract_strided_slice %16 {offsets = [0, 0], sizes = [16, 128], strides = [1, 1]} : vector<32x128xf32> to vector<16x128xf32>
    %cst_8 = arith.constant dense<0xFF800000> : vector<128xf32>
    %20 = vector.multi_reduction <maximumf>, %17, %cst_8 [0] : vector<16x128xf32> to vector<128xf32>
    %21 = vector.shape_cast %20 : vector<128xf32> to vector<1x128xf32>
    %22 = vector.broadcast %21 : vector<1x128xf32> to vector<16x128xf32>
    %23 = arith.subf %17, %22 : vector<16x128xf32>
    %24 = math.exp %23 : vector<16x128xf32>
    %cst_9 = arith.constant dense<0.000000e+00> : vector<128xf32>
    %25 = vector.multi_reduction <add>, %24, %cst_9 [0] : vector<16x128xf32> to vector<128xf32>
    %26 = vector.shape_cast %25 : vector<128xf32> to vector<1x128xf32>
    %27 = tpu.reciprocal %26 : vector<1x128xf32> -> vector<1x128xf32>
    %28 = vector.broadcast %27 : vector<1x128xf32> to vector<16x128xf32>
    %29 = arith.mulf %24, %28 : vector<16x128xf32>
    %30 = tpu.transpose %29, [1, 0] : vector<16x128xf32> -> vector<128x16xf32>
    %cst_10 = arith.constant dense<0.000000e+00> : vector<128x128xf32>
    %31 = tpu.matmul %30, %18, %cst_10 {dimension_numbers = #tpu.dot_dimension_numbers<[1], [0], [0], [1], [0, 0, 1, 1], [], []>} : vector<128x16xf32>, vector<16x128xf32>, vector<128x128xf32> -> vector<128x128xf32>
    %32 = arith.mulf %31, %6 : vector<128x128xf32>
    %cst_11 = arith.constant dense<0.000000e+00> : vector<16x128xf32>
    %33 = tpu.matmul %19, %32, %cst_11 {dimension_numbers = #tpu.dot_dimension_numbers<[1], [0], [0], [1], [0, 0, 1, 1], [], []>} : vector<16x128xf32>, vector<128x128xf32>, vector<16x128xf32> -> vector<16x128xf32>
    %34 = vector.extract_strided_slice %4 {offsets = [16, 0], sizes = [16, 128], strides = [1, 1]} : vector<32x128xf32> to vector<16x128xf32>
    %35 = vector.extract_strided_slice %5 {offsets = [16, 0], sizes = [16, 128], strides = [1, 1]} : vector<32x128xf32> to vector<16x128xf32>
    %36 = vector.extract_strided_slice %16 {offsets = [16, 0], sizes = [16, 128], strides = [1, 1]} : vector<32x128xf32> to vector<16x128xf32>
    %cst_12 = arith.constant dense<0xFF800000> : vector<128xf32>
    %37 = vector.multi_reduction <maximumf>, %34, %cst_12 [0] : vector<16x128xf32> to vector<128xf32>
    %38 = vector.shape_cast %37 : vector<128xf32> to vector<1x128xf32>
    %39 = vector.broadcast %38 : vector<1x128xf32> to vector<16x128xf32>
    %40 = arith.subf %34, %39 : vector<16x128xf32>
    %41 = math.exp %40 : vector<16x128xf32>
    %cst_13 = arith.constant dense<0.000000e+00> : vector<128xf32>
    %42 = vector.multi_reduction <add>, %41, %cst_13 [0] : vector<16x128xf32> to vector<128xf32>
    %43 = vector.shape_cast %42 : vector<128xf32> to vector<1x128xf32>
    %44 = tpu.reciprocal %43 : vector<1x128xf32> -> vector<1x128xf32>
    %45 = vector.broadcast %44 : vector<1x128xf32> to vector<16x128xf32>
    %46 = arith.mulf %41, %45 : vector<16x128xf32>
    %47 = tpu.transpose %46, [1, 0] : vector<16x128xf32> -> vector<128x16xf32>
    %cst_14 = arith.constant dense<0.000000e+00> : vector<128x128xf32>
    %48 = tpu.matmul %47, %35, %cst_14 {dimension_numbers = #tpu.dot_dimension_numbers<[1], [0], [0], [1], [0, 0, 1, 1], [], []>} : vector<128x16xf32>, vector<16x128xf32>, vector<128x128xf32> -> vector<128x128xf32>
    %49 = arith.mulf %48, %6 : vector<128x128xf32>
    %cst_15 = arith.constant dense<0.000000e+00> : vector<16x128xf32>
    %50 = tpu.matmul %36, %49, %cst_15 {dimension_numbers = #tpu.dot_dimension_numbers<[1], [0], [0], [1], [0, 0, 1, 1], [], []>} : vector<16x128xf32>, vector<128x128xf32>, vector<16x128xf32> -> vector<16x128xf32>
    %51 = tpu.concatenate %33, %50 in 0 : vector<16x128xf32>, vector<16x128xf32> -> vector<32x128xf32>
    %c0_16 = arith.constant 0 : index
    %c0_17 = arith.constant 0 : index
    %52 = vector.load %arg3[%c0_16, %c0_17] : memref<128x8xf32, #tpu.memory_space<vmem>>, vector<128x8xf32>
    %cst_18 = arith.constant dense<0.000000e+00> : vector<32x8xf32>
    %53 = tpu.matmul %51, %52, %cst_18 {dimension_numbers = #tpu.dot_dimension_numbers<[1], [0], [0], [1], [0, 0, 1, 1], [], []>} : vector<32x128xf32>, vector<128x8xf32>, vector<32x8xf32> -> vector<32x8xf32>
    %c0_19 = arith.constant 0 : index
    %c0_20 = arith.constant 0 : index
    %54 = vector.load %arg4[%c0_19, %c0_20] : memref<2x8xf32, #tpu.memory_space<vmem>>, vector<1x8xf32>
    %55 = vector.broadcast %54 : vector<1x8xf32> to vector<32x8xf32>
    %56 = arith.addf %53, %55 : vector<32x8xf32>
    %57 = arith.mulf %56, %56 : vector<32x8xf32>
    %cst_21 = arith.constant dense<0.000000e+00> : vector<32xf32>
    %58 = vector.multi_reduction <add>, %57, %cst_21 [1] : vector<32x8xf32> to vector<32xf32>
    %59 = vector.shape_cast %58 : vector<32xf32> to vector<32x1xf32>
    %cst_22 = arith.constant 1.000000e-24 : f32
    %60 = vector.broadcast %cst_22 : f32 to vector<32x1xf32>
    %61 = arith.maximumf %59, %60 : vector<32x1xf32>
    %62 = math.rsqrt %61 : vector<32x1xf32>
    %63 = vector.broadcast %62 : vector<32x1xf32> to vector<32x8xf32>
    %64 = arith.mulf %56, %63 : vector<32x8xf32>
    %c1 = arith.constant 1 : index
    %c0_23 = arith.constant 0 : index
    %65 = vector.load %arg4[%c1, %c0_23] : memref<2x8xf32, #tpu.memory_space<vmem>>, vector<1x8xf32>
    %66 = vector.broadcast %65 : vector<1x8xf32> to vector<32x8xf32>
    %67 = arith.mulf %64, %66 : vector<32x8xf32>
    %c0_24 = arith.constant 0 : index
    %c0_25 = arith.constant 0 : index
    %68 = vector.load %arg6[%c0_24, %c0_25] : memref<32x8xf32, #tpu.memory_space<vmem>>, vector<32x8xf32>
    tpu.vector_store %arg6[%c0_24, %c0_25], %67 {strides = array<i32>} : memref<32x8xf32, #tpu.memory_space<vmem>>, vector<32x8xf32>,
    return
  }
  func.func @transform_0(%arg0: i32) -> (i32, i32) {
    %c0_i32 = arith.constant 0 : i32
    %c0_i32_0 = arith.constant 0 : i32
    %c0_i32_1 = arith.constant 0 : i32
    return %c0_i32, %c0_i32_0 : i32, i32
  }
  func.func @transform_1(%arg0: i32) -> (i32, i32) {
    %c0_i32 = arith.constant 0 : i32
    %c0_i32_0 = arith.constant 0 : i32
    %c0_i32_1 = arith.constant 0 : i32
    return %c0_i32, %c0_i32_0 : i32, i32
  }
  func.func @transform_2(%arg0: i32) -> (i32, i32) {
    %c0_i32 = arith.constant 0 : i32
    %c0_i32_0 = arith.constant 0 : i32
    %c0_i32_1 = arith.constant 0 : i32
    return %c0_i32, %c0_i32_0 : i32, i32
  }
  func.func @transform_3(%arg0: i32) -> (i32, i32) {
    %c0_i32 = arith.constant 0 : i32
    %c0_i32_0 = arith.constant 0 : i32
    %c0_i32_1 = arith.constant 0 : i32
    return %c0_i32, %c0_i32_0 : i32, i32
  }
  func.func @transform_4(%arg0: i32) -> (i32, i32) {
    %c0_i32 = arith.constant 0 : i32
    %c0_i32_0 = arith.constant 0 : i32
    %c0_i32_1 = arith.constant 0 : i32
    return %c0_i32, %c0_i32_0 : i32, i32
  }
  func.func @transform_5(%arg0: i32) -> (i32, i32) {
    %c0_i32 = arith.constant 0 : i32
    %c0_i32_0 = arith.constant 0 : i32
    %c0_i32_1 = arith.constant 0 : i32
    return %c0_i32, %c0_i32_0 : i32, i32
  }
}

</mosaic_0001>

<bundles_post_ra>
// kernel: tpu_custom_call.1
= control target key start
LH: loop header
LB: loop body
LE: loop exit
PB: predicated region body
PF: predicated region fallthrough
CT: control target
= control target key end

     0   :  { %v1719_v2 = vmov 0.0   ;;  %vm27_vm0 = vcmask 64512   ;;  %vm402_vm1 = vcmask 130048   ;;  %s2051_s1 = inlined_call_operand.vmem [shape: f32[8,384], index: 1, kind: input, shape index: {}]   ;;  %s2052_s0 = inlined_call_operand.vmem [shape: f32[32,8], index: 0, kind: input, shape index: {}]   ;;  %s2053_s4 = inlined_call_operand.vmem [shape: f32[128,128], index: 4, kind: input, shape index: {}]   ;;  %s2054_s2 = inlined_call_operand.vmem [shape: f32[128,8], index: 2, kind: input, shape index: {}]   ;;  %s2055_s3 = inlined_call_operand.vmem [shape: f32[2,8], index: 3, kind: input, shape index: {}]   ;;  %s2056_s5 = inlined_call_operand.vmem [shape: f32[32,8], index: 5, kind: output, shape index: {}]  }
   0x1   :  { %v25_v0 = vld [vmem:[%s2051_s1 + $0x8] sm:$0xff]  ;;  %v24_v1 = vld [vmem:[%s2051_s1] sm:$0xff]  ;;  %104 = vmatprep.mubr.f32.mxu0 %v1719_v2  ;;  %v26_v4 = vld [vmem:[%s2051_s1 + $0x10] sm:$0xff] }
   0x2   :  { %v20_v3 = vld [vmem:[%s2052_s0] sm:$0xff]  ;;  %40 = vmatprep.subr.mxu0 %v25_v0  ;;  %1336 = vmatprep.subr.mxu1 %v26_v4  ;;  %v21_v5 = vld [vmem:[%s2052_s0 + $0x8] sm:$0xff]  ;;  %v22_v6 = vld [vmem:[%s2052_s0 + $0x10] sm:$0xff] }
   0x3   :  { %1338 = vmatprep.mubr.msk.f32.mxu1 %vm27_vm0, %v20_v3  ;;  %41 = vmatpush1.msra.mxu0 %v24_v1  ;;  %v23_v7 = vld [vmem:[%s2052_s0 + $0x18] sm:$0xff]  ;;  %v1782_v8 = vld [vmem:[%s2053_s4] sm:$0xff]  ;;  %v1787_v9 = vld [vmem:[%s2053_s4 + $0x8] sm:$0xff] }
   0x4   :  { %1177 = vmatmul.mubr.msk.f32.vlgmr.msra.gmra.mrb[0].mxu0 %vm27_vm0, %v20_v3  ;;  %1337 = vmatpush3.msra.mxu1 %v26_v4  ;;  %v1792_v10 = vld [vmem:[%s2053_s4 + $0x10] sm:$0xff]  ;;  %v1546_v11 = vpack.c.bf16 %v1787_v9, %v1782_v8  ;;  %v1799_v12 = vld [vmem:[%s2053_s4 + $0x18] sm:$0xff]  ;;  %v1806_v14 = vld [vmem:[%s2053_s4 + $0x20] sm:$0xff] }
   0x5   :  { %110 = vmatprep.mubr.f32.mxu0 %v1719_v2  ;;  %1339 = vmatmul.mubr.msk.f32.vlgmr.msra.gmra.mrb[0].mxu1 %vm27_vm0, %v21_v5  ;;  %v1550_v13 = vpack.c.bf16 %v1799_v12, %v1792_v10  ;;  %v1811_v15 = vld [vmem:[%s2053_s4 + $0x28] sm:$0xff]  ;;  %v1818_v17 = vld [vmem:[%s2053_s4 + $0x30] sm:$0xff]  ;;  %v1823_v18 = vld [vmem:[%s2053_s4 + $0x38] sm:$0xff] }
   0x6   :  { %1341 = vmatprep.mubr.msk.f32.mxu1 %vm27_vm0, %v22_v6  ;;  %1547 = vmatprep.subr.bf16.mxu0 %v1546_v11  ;;  %v1554_v16 = vpack.c.bf16 %v1811_v15, %v1806_v14  ;;  %v1558_v19 = vpack.c.bf16 %v1823_v18, %v1818_v17  ;;  %v1842_v36 = vld [vmem:[%s2053_s4 + $0x40] sm:$0xff]  ;;  %v1847_v37 = vld [vmem:[%s2053_s4 + $0x48] sm:$0xff]  ;;  %v1854_v44 = vld [vmem:[%s2053_s4 + $0x50] sm:$0xff] }
   0x7   :  { %1549 = vmatpush3.bf16.msra.mxu0 %v1546_v11  ;;  %v1562_v38 = vpack.c.bf16 %v1847_v37, %v1842_v36  ;;  %v1859_v45 = vld [vmem:[%s2053_s4 + $0x58] sm:$0xff]  ;;  %v1866_v51 = vld [vmem:[%s2053_s4 + $0x60] sm:$0xff]  ;;  %v1871_v52 = vld [vmem:[%s2053_s4 + $0x68] sm:$0xff] }
   0x8   :  { %1178 = vmatmul.mubr.msk.f32.gmra.mrb[2].mxu0 %vm27_vm0, %v21_v5  ;;  %1551 = vmatprep.subr.bf16.mxu0 %v1550_v13  ;;  %v1566_v46 = vpack.c.bf16 %v1859_v45, %v1854_v44  ;;  %v1570_v53 = vpack.c.bf16 %v1871_v52, %v1866_v51  ;;  %v1878_v57 = vld [vmem:[%s2053_s4 + $0x70] sm:$0xff]  ;;  %v1883_v58 = vld [vmem:[%s2053_s4 + $0x78] sm:$0xff] }
   0x9   :  { %116 = vmatprep.mubr.f32.mxu0 %v1719_v2  ;;  %1342 = vmatmul.mubr.msk.f32.gmra.mrb[2].mxu1 %vm27_vm0, %v23_v7  ;;  %v1574_v59 = vpack.c.bf16 %v1883_v58, %v1878_v57 }
   0xb   :  { %1553 = vmatpush3.bf16.msra.mxu0 %v1550_v13 }
   0xc   :  { %1179 = vmatmul.mubr.msk.f32.gmra.mrb[4].mxu0 %vm27_vm0, %v22_v6  ;;  %1555 = vmatprep.subr.bf16.mxu0 %v1554_v16 }
   0xd   :  { %122 = vmatprep.mubr.f32.mxu0 %v1719_v2 }
   0xf   :  { %1557 = vmatpush3.bf16.msra.mxu0 %v1554_v16 }
  0x10   :  { %1180 = vmatmul.mubr.msk.f32.gmra.mrb[6].mxu0 %vm27_vm0, %v23_v7  ;;  %1559 = vmatprep.subr.bf16.mxu0 %v1558_v19 }
  0x13   :  { %1561 = vmatpush3.bf16.msra.mxu0 %v1558_v19 }
  0x14   :  { %1563 = vmatprep.subr.bf16.mxu0 %v1562_v38 }
  0x17   :  { %1565 = vmatpush3.bf16.msra.mxu0 %v1562_v38 }
  0x18   :  { %1567 = vmatprep.subr.bf16.mxu0 %v1566_v46 }
  0x1b   :  { %1569 = vmatpush3.bf16.msra.mxu0 %v1566_v46 }
  0x1c   :  { %1571 = vmatprep.subr.bf16.mxu0 %v1570_v53 }
  0x1f   :  { %1573 = vmatpush3.bf16.msra.mxu0 %v1570_v53 }
  0x20   :  { %1575 = vmatprep.subr.bf16.mxu0 %v1574_v59 }
  0x23   :  { %1577 = vmatpush3.bf16.msra.mxu0 %v1574_v59 }
  0xd7   :  { %v1827_v20 = vpop.f32.mrb[0].mxu0 }
  0xd8   :  { %230 = vmax.xlane.f32.xlu0 %v1827_v20  ;;  %v108_v21 = vpop.f32.mrb[1].mxu0  ;;  %v1340_v5 = vpop.f32.mrb[0].mxu1 }
  0xd9   :  { %v195_v7 = vpop.f32.mrb[1].mxu1 }
  0xda   :  { %v1578_v16 = vpack.c.bf16 %v1340_v5, %v195_v7 }
  0xdb   :  { %v1830_v22 = vpop.f32.mrb[2].mxu0 }
  0xdc   :  { %232 = vmax.xlane.f32.xlu0 %v1830_v22  ;;  %v114_v23 = vpop.f32.mrb[3].mxu0  ;;  %1579 = vmatprep.subr.bf16.mxu1 %v1578_v16 }
  0xdd   :  { %v347_v24 = vmax.f32 %v108_v21, %v114_v23  ;;  %1581 = vmatpush3.bf16.msra.mxu1 %v1578_v16 }
  0xdf   :  { %v348_v25 = vrot.slane %v347_v24, 4  ;;  %v1833_v26 = vpop.f32.mrb[4].mxu0 }
  0xe0   :  { %234 = vmax.xlane.f32.xlu1 %v1833_v26  ;;  %v120_v27 = vpop.f32.mrb[5].mxu0 }
  0xe1   :  { %v349_v28 = vmax.f32 %v347_v24, %v348_v25 }
  0xe3   :  { %v350_v29 = vrot.slane %v349_v28, 2  ;;  %v1836_v30 = vpop.f32.mrb[6].mxu0 }
  0xe4   :  { %236 = vmax.xlane.f32.xlu1 %v1836_v30  ;;  %v126_v31 = vpop.f32.mrb[7].mxu0 }
  0xe5   :  { %v351_v32 = vmax.f32 %v349_v28, %v350_v29  ;;  %v687_v33 = vmax.f32 %v120_v27, %v126_v31 }
  0xe7   :  { %v352_v34 = vrot.slane %v351_v32, 1  ;;  %v688_v35 = vrot.slane %v687_v33, 4 }
  0xe9   :  { %v353_v39 = vmax.f32 %v351_v32, %v352_v34  ;;  %v689_v40 = vmax.f32 %v687_v33, %v688_v35  ;;  %v1343_v34 = vpop.f32.mrb[2].mxu1 }
  0xea   :  { %v205_v38 = vpop.f32.mrb[3].mxu1 }
  0xeb   :  { %v354_v41 = vsub.f32 %v108_v21, %v353_v39  ;;  %v355_v42 = vsub.f32 %v114_v23, %v353_v39  ;;  %v690_v43 = vrot.slane %v689_v40, 2 }
  0xed   :  { %v356_v47 = vmul.f32 1.442695, %v354_v41  ;;  %v358_v48 = vmul.f32 1.442695, %v355_v42  ;;  %v691_v49 = vmax.f32 %v689_v40, %v690_v43  ;;  %v1614_v41 = vpack.c.bf16 %v1343_v34, %v205_v38 }
  0xef   :  { %1683 = vpow2.f32 %v356_v47  ;;  %v692_v50 = vrot.slane %v691_v49, 1  ;;  %1615 = vmatprep.subr.bf16.mxu0 %v1614_v41 }
  0xf0   :  { %1685 = vpow2.f32 %v358_v48 }
  0xf1   :  { %v693_v54 = vmax.f32 %v691_v49, %v692_v50 }
  0xf3   :  { %v694_v55 = vsub.f32 %v120_v27, %v693_v54  ;;  %v695_v56 = vsub.f32 %v126_v31, %v693_v54 }
  0xf5   :  { %v696_v60 = vmul.f32 1.442695, %v694_v55  ;;  %v698_v61 = vmul.f32 1.442695, %v695_v56 }
  0xf7   :  { %1687 = vpow2.f32 %v696_v60 }
  0xf8   :  { %1689 = vpow2.f32 %v698_v61 }
  0xf9   :  { %v1684_v62 = vpop.eup %1683 }
  0xfa   :  { %v1686_v63 = vpop.eup %1685 }
  0xfb   :  { %v360_v0 = vadd.f32 %v1686_v63, %v1684_v62 }
  0xfd   :  { %v361_v1 = vrot.slane %v360_v0, 4 }
  0xff   :  { %v362_v2 = vadd.f32 %v361_v1, %v360_v0 }
 0x101   :  { %v1688_v3 = vpop.eup %1687  ;;  %v363_v4 = vrot.slane %v362_v2, 2 }
 0x102   :  { %v1690_v6 = vpop.eup %1689 }
 0x103   :  { %v700_v11 = vadd.f32 %v1690_v6, %v1688_v3  ;;  %v364_v13 = vadd.f32 %v363_v4, %v362_v2 }
 0x105   :  { %v701_v19 = vrot.slane %v700_v11, 4  ;;  %v365_v21 = vrot.slane %v364_v13, 1 }
 0x107   :  { %v702_v23 = vadd.f32 %v701_v19, %v700_v11  ;;  %v366_v24 = vadd.f32 %v365_v21, %v364_v13 }
 0x109   :  { %1691 = vrcp.f32 %v366_v24  ;;  %v703_v25 = vrot.slane %v702_v23, 2 }
 0x10b   :  { %v704_v27 = vadd.f32 %v703_v25, %v702_v23 }
 0x10d   :  { %v705_v28 = vrot.slane %v704_v27, 1 }
 0x10f   :  { %v706_v29 = vadd.f32 %v705_v28, %v704_v27 }
 0x111   :  { %1693 = vrcp.f32 %v706_v29 }
 0x113   :  { %v1692_v31 = vpop.eup %1691 }
 0x114   :  { %v368_v32 = vmul.f32 %v1692_v31, %v1684_v62  ;;  %v369_v33 = vmul.f32 %v1692_v31, %v1686_v63 }
 0x116   :  { %370 = vxpose.xlu0.b32.start [1/2] (short) %v368_v32, 128 }
 0x11a   :  { %371 = vxpose.xlu0.b32.end [2/2] (short) %v369_v33, 128 }
 0x11b   :  { %v1694_v35 = vpop.eup %1693 }
 0x11c   :  { %v708_v39 = vmul.f32 %v1694_v35, %v1688_v3  ;;  %v709_v40 = vmul.f32 %v1694_v35, %v1690_v6 }
 0x11e   :  { %710 = vxpose.xlu1.b32.start [1/2] (short) %v708_v39, 128 }
 0x122   :  { %711 = vxpose.xlu1.b32.end [2/2] (short) %v709_v40, 128 }
 0x165   :  { %v231_v42 = vpop.xlane.xlu0 %230 }
 0x166   :  { %v238_v43 = vsub.f32 %v1827_v20, %v231_v42 }
 0x168   :  { %v242_v46 = vmul.f32 1.442695, %v238_v43 }
 0x169   :  { %v233_v47 = vpop.xlane.xlu0 %232 }
 0x16a   :  { %1695 = vpow2.f32 %v242_v46  ;;  %v239_v48 = vsub.f32 %v1830_v22, %v233_v47 }
 0x16c   :  { %v244_v49 = vmul.f32 1.442695, %v239_v48 }
 0x16d   :  { %v235_v50 = vpop.xlane.xlu1 %234 }
 0x16e   :  { %1697 = vpow2.f32 %v244_v49  ;;  %v240_v53 = vsub.f32 %v1833_v26, %v235_v50 }
 0x170   :  { %v246_v54 = vmul.f32 1.442695, %v240_v53 }
 0x171   :  { %v237_v55 = vpop.xlane.xlu1 %236 }
 0x172   :  { %1699 = vpow2.f32 %v246_v54  ;;  %v241_v56 = vsub.f32 %v1836_v30, %v237_v55 }
 0x174   :  { %v1891_v59 = vpop.eup %1695  ;;  %v248_v60 = vmul.f32 1.442695, %v241_v56 }
 0x175   :  { %1376 = vmatprep.mubr.f32.mxu0 %v1891_v59 }
 0x176   :  { %1701 = vpow2.f32 %v248_v60 }
 0x178   :  { %v1894_v20 = vpop.eup %1697 }
 0x179   :  { %1377 = vmatmul.mubr.f32.vlgmr.msra.gmra.mrb[8].mxu0 %v1894_v20 }
 0x17a   :  { %1617 = vmatpush3.bf16.msra.mxu0 %v1614_v41 }
 0x17c   :  { %v1897_v22 = vpop.eup %1699 }
 0x17d   :  { %1379 = vmatprep.mubr.f32.mxu0 %v1897_v22 }
 0x180   :  { %v1900_v26 = vpop.eup %1701 }
 0x181   :  { %1380 = vmatmul.mubr.f32.gmra.mrb[10].mxu0 %v1900_v26 }
 0x196   :  { %v386_v30 = vpop.trf.xlu0 }
 0x197   :  { %1386 = vmatprep.mubr.msk.f32.mxu1 %vm402_vm1, %v386_v30 }
 0x19a   :  { %v387_v61 = vpop.trf.xlu0 }
 0x19b   :  { %1387 = vmatmul.mubr.msk.f32.vlgmr.msra.gmra.mrb[4].mxu1 %vm402_vm1, %v387_v61 }
 0x19e   :  { %v388_v62 = vpop.trf.xlu0  ;;  %v726_v63 = vpop.trf.xlu1 }
 0x19f   :  { %1449 = vmatprep.mubr.msk.f32.mxu0 %vm402_vm1, %v726_v63  ;;  %1389 = vmatprep.mubr.msk.f32.mxu1 %vm402_vm1, %v388_v62 }
 0x1a2   :  { %v389_v0 = vpop.trf.xlu0  ;;  %v727_v1 = vpop.trf.xlu1 }
 0x1a3   :  { %1450 = vmatmul.mubr.msk.f32.vlgmr.msra.gmra.mrb[12].mxu0 %vm402_vm1, %v727_v1  ;;  %1390 = vmatmul.mubr.msk.f32.gmra.mrb[6].mxu1 %vm402_vm1, %v389_v0 }
 0x1a6   :  { %v390_v2 = vpop.trf.xlu0  ;;  %v728_v3 = vpop.trf.xlu1 }
 0x1a7   :  { %1452 = vmatprep.mubr.msk.f32.mxu0 %vm402_vm1, %v728_v3  ;;  %1392 = vmatprep.mubr.msk.f32.mxu1 %vm402_vm1, %v390_v2 }
 0x1aa   :  { %v391_v4 = vpop.trf.xlu0  ;;  %v729_v5 = vpop.trf.xlu1 }
 0x1ab   :  { %1453 = vmatmul.mubr.msk.f32.gmra.mrb[14].mxu0 %vm402_vm1, %v729_v5  ;;  %1393 = vmatmul.mubr.msk.f32.gmra.mrb[8].mxu1 %vm402_vm1, %v391_v4 }
 0x1ae   :  { %v392_v6 = vpop.trf.xlu0  ;;  %v730_v7 = vpop.trf.xlu1 }
 0x1af   :  { %1455 = vmatprep.mubr.msk.f32.mxu0 %vm402_vm1, %v730_v7  ;;  %1395 = vmatprep.mubr.msk.f32.mxu1 %vm402_vm1, %v392_v6 }
 0x1b2   :  { %v393_v11 = vpop.trf.xlu0  ;;  %v731_v13 = vpop.trf.xlu1 }
 0x1b3   :  { %1456 = vmatmul.mubr.msk.f32.gmra.mrb[16].mxu0 %vm402_vm1, %v731_v13  ;;  %1396 = vmatmul.mubr.msk.f32.gmra.mrb[10].mxu1 %vm402_vm1, %v393_v11 }
 0x1b6   :  { %v394_v16 = vpop.trf.xlu0  ;;  %v732_v19 = vpop.trf.xlu1 }
 0x1b7   :  { %1458 = vmatprep.mubr.msk.f32.mxu0 %vm402_vm1, %v732_v19  ;;  %1398 = vmatprep.mubr.msk.f32.mxu1 %vm402_vm1, %v394_v16 }
 0x1ba   :  { %v395_v21 = vpop.trf.xlu0  ;;  %v733_v23 = vpop.trf.xlu1 }
 0x1bb   :  { %1459 = vmatmul.mubr.msk.f32.gmra.mrb[18].mxu0 %vm402_vm1, %v733_v23  ;;  %1399 = vmatmul.mubr.msk.f32.gmra.mrb[12].mxu1 %vm402_vm1, %v395_v21 }
 0x1be   :  { %v396_v24 = vpop.trf.xlu0  ;;  %v734_v25 = vpop.trf.xlu1 }
 0x1bf   :  { %1461 = vmatprep.mubr.msk.f32.mxu0 %vm402_vm1, %v734_v25  ;;  %1401 = vmatprep.mubr.msk.f32.mxu1 %vm402_vm1, %v396_v24 }
 0x1c2   :  { %v397_v27 = vpop.trf.xlu0  ;;  %v735_v28 = vpop.trf.xlu1 }
 0x1c3   :  { %1462 = vmatmul.mubr.msk.f32.gmra.mrb[20].mxu0 %vm402_vm1, %v735_v28  ;;  %1402 = vmatmul.mubr.msk.f32.gmra.mrb[14].mxu1 %vm402_vm1, %v397_v27 }
 0x1c6   :  { %v398_v29 = vpop.trf.xlu0  ;;  %v736_v31 = vpop.trf.xlu1 }
 0x1c7   :  { %1464 = vmatprep.mubr.msk.f32.mxu0 %vm402_vm1, %v736_v31  ;;  %1404 = vmatprep.mubr.msk.f32.mxu1 %vm402_vm1, %v398_v29 }
 0x1ca   :  { %v399_v32 = vpop.trf.xlu0  ;;  %v737_v33 = vpop.trf.xlu1 }
 0x1cb   :  { %1465 = vmatmul.mubr.msk.f32.gmra.mrb[22].mxu0 %vm402_vm1, %v737_v33  ;;  %1405 = vmatmul.mubr.msk.f32.gmra.mrb[16].mxu1 %vm402_vm1, %v399_v32 }
 0x1ce   :  { %v400_v34 = vpop.trf.xlu0  ;;  %v738_v35 = vpop.trf.xlu1 }
 0x1cf   :  { %1467 = vmatprep.mubr.msk.f32.mxu0 %vm402_vm1, %v738_v35  ;;  %1407 = vmatprep.mubr.msk.f32.mxu1 %vm402_vm1, %v400_v34 }
 0x1d2   :  { %v401_v38 = vpop.trf.xlu0  ;;  %v739_v39 = vpop.trf.xlu1 }
 0x1d3   :  { %1408 = vmatmul.mubr.msk.f32.gmra.mrb[18].mxu1 %vm402_vm1, %v401_v38  ;;  %1468 = vmatmul.mubr.msk.f32.gmra.mrb[24].mxu0 %vm402_vm1, %v739_v39 }
 0x1d6   :  { %v740_v40 = vpop.trf.xlu1 }
 0x1d7   :  { %1470 = vmatprep.mubr.msk.f32.mxu0 %vm402_vm1, %v740_v40 }
 0x1da   :  { %v741_v41 = vpop.trf.xlu1 }
 0x1db   :  { %1471 = vmatmul.mubr.msk.f32.gmra.mrb[26].mxu0 %vm402_vm1, %v741_v41 }
 0x24c   :  { %v1935_v42 = vpop.f32.mrb[8].mxu0 }
 0x24d   :  { %v316_v43 = vpop.f32.mrb[9].mxu0 }
 0x24e   :  { %1703 = vrcp.f32 %v316_v43 }
 0x254   :  { %v1937_v46 = vpop.f32.mrb[10].mxu0 }
 0x255   :  { %v326_v47 = vpop.f32.mrb[11].mxu0 }
 0x256   :  { %1705 = vrcp.f32 %v326_v47 }
 0x257   :  { %1707 = vrcp.f32 %v1935_v42 }
 0x258   :  { %v1704_v48 = vpop.eup %1703  ;;  %1709 = vrcp.f32 %v1937_v46 }
 0x259   :  { %v339_v49 = vmul.f32 %v1704_v48, %v1891_v59 }
 0x25b   :  { %v343_v50 = vmul.f32 0.17677669, %v339_v49 }
 0x25d   :  { %1442 = vmatprep.mubr.f32.mxu1 %v343_v50 }
 0x260   :  { %v1706_v53 = vpop.eup %1705 }
 0x261   :  { %v341_v54 = vmul.f32 %v1706_v53, %v1897_v22 }
 0x263   :  { %v345_v55 = vmul.f32 0.17677669, %v341_v54 }
 0x265   :  { %1505 = vmatprep.mubr.f32.mxu0 %v345_v55 }
 0x26e   :  { %v1388_v56 = vpop.f32.mrb[4].mxu1 }
 0x26f   :  { %v597_v60 = vmul.f32 %v1388_v56, %v1787_v9  ;;  %v517_v30 = vpop.f32.mrb[5].mxu1 }
 0x270   :  { %v596_v61 = vmul.f32 %v517_v30, %v1782_v8 }
 0x272   :  { %v1582_v62 = vpack.c.bf16 %v597_v60, %v596_v61 }
 0x274   :  { %1583 = vmatprep.subr.bf16.mxu1 %v1582_v62 }
 0x275   :  { %1585 = vmatpush3.bf16.msra.mxu1 %v1582_v62 }
 0x276   :  { %v1451_v63 = vpop.f32.mrb[12].mxu0  ;;  %v1391_v0 = vpop.f32.mrb[6].mxu1 }
 0x277   :  { %v936_v59 = vmul.f32 %v1451_v63, %v1787_v9  ;;  %v856_v1 = vpop.f32.mrb[13].mxu0  ;;  %v599_v2 = vmul.f32 %v1391_v0, %v1799_v12  ;;  %v527_v3 = vpop.f32.mrb[7].mxu1 }
 0x278   :  { %v935_v22 = vmul.f32 %v856_v1, %v1782_v8  ;;  %v598_v4 = vmul.f32 %v527_v3, %v1792_v10 }
 0x27a   :  { %v1618_v5 = vpack.c.bf16 %v936_v59, %v935_v22  ;;  %v1586_v6 = vpack.c.bf16 %v599_v2, %v598_v4  ;;  %v1708_v4 = vpop.eup %1707 }
 0x27c   :  { %1619 = vmatprep.subr.bf16.mxu0 %v1618_v5  ;;  %1587 = vmatprep.subr.bf16.mxu1 %v1586_v6 }
 0x27d   :  { %1621 = vmatpush3.bf16.msra.mxu0 %v1618_v5  ;;  %1589 = vmatpush3.bf16.msra.mxu1 %v1586_v6 }
 0x27e   :  { %v1454_v7 = vpop.f32.mrb[14].mxu0  ;;  %v1394_v11 = vpop.f32.mrb[8].mxu1 }
 0x27f   :  { %v938_v13 = vmul.f32 %v1454_v7, %v1799_v12  ;;  %v866_v16 = vpop.f32.mrb[15].mxu0  ;;  %v601_v9 = vmul.f32 %v1394_v11, %v1811_v15  ;;  %v537_v19 = vpop.f32.mrb[9].mxu1  ;;  %v1027_v11 = vld [vmem:[%s2054_s2 + $0x8] sm:$0xff] }
 0x280   :  { %v937_v21 = vmul.f32 %v866_v16, %v1792_v10  ;;  %v600_v8 = vmul.f32 %v537_v19, %v1806_v14  ;;  %v340_v16 = vmul.f32 %v1708_v4, %v1894_v20  ;;  %v1710_v20 = vpop.eup %1709 }
 0x282   :  { %v1622_v23 = vpack.c.bf16 %v938_v13, %v937_v21  ;;  %v1590_v24 = vpack.c.bf16 %v601_v9, %v600_v8  ;;  %v1029_v8 = vld [vmem:[%s2054_s2 + $0x18] sm:$0xff] }
 0x284   :  { %1623 = vmatprep.subr.bf16.mxu0 %v1622_v23  ;;  %1591 = vmatprep.subr.bf16.mxu1 %v1590_v24 }
 0x285   :  { %1625 = vmatpush3.bf16.msra.mxu0 %v1622_v23  ;;  %1593 = vmatpush3.bf16.msra.mxu1 %v1590_v24  ;;  %v344_v24 = vmul.f32 0.17677669, %v340_v16  ;;  %v1218_v16 = vld [vmem:[%s2055_s3 + $0x1] ss:$0 sm:$0xff] }
 0x286   :  { %v1457_v25 = vpop.f32.mrb[16].mxu0  ;;  %v1397_v27 = vpop.f32.mrb[10].mxu1 }
 0x287   :  { %v940_v28 = vmul.f32 %v1457_v25, %v1811_v15  ;;  %v876_v29 = vpop.f32.mrb[17].mxu0  ;;  %v603_v12 = vmul.f32 %v1397_v27, %v1823_v18  ;;  %v547_v31 = vpop.f32.mrb[11].mxu1 }
 0x288   :  { %v939_v32 = vmul.f32 %v876_v29, %v1806_v14  ;;  %v602_v10 = vmul.f32 %v547_v31, %v1818_v17  ;;  %v1031_v29 = vld [vmem:[%s2054_s2 + $0x28] sm:$0xff]  ;;  %v342_v31 = vmul.f32 %v1710_v20, %v1900_v26  ;;  %v1034_v26 = vld [vmem:[%s2054_s2 + $0x40] sm:$0xff] }
 0x28a   :  { %v1626_v33 = vpack.c.bf16 %v940_v28, %v939_v32  ;;  %v1594_v34 = vpack.c.bf16 %v603_v12, %v602_v10  ;;  %v1030_v28 = vld [vmem:[%s2054_s2 + $0x20] sm:$0xff] }
 0x28b   :  { %v1658_v10 = vpack.c.bf16 %v1031_v29, %v1030_v28 }
 0x28c   :  { %1627 = vmatprep.subr.bf16.mxu0 %v1626_v33  ;;  %1595 = vmatprep.subr.bf16.mxu1 %v1594_v34 }
 0x28d   :  { %1629 = vmatpush3.bf16.msra.mxu0 %v1626_v33  ;;  %1597 = vmatpush3.bf16.msra.mxu1 %v1594_v34  ;;  %v1033_v33 = vld [vmem:[%s2054_s2 + $0x38] sm:$0xff]  ;;  %v346_v34 = vmul.f32 0.17677669, %v342_v31 }
 0x28e   :  { %v1460_v35 = vpop.f32.mrb[18].mxu0  ;;  %v1400_v38 = vpop.f32.mrb[12].mxu1 }
 0x28f   :  { %v942_v39 = vmul.f32 %v1460_v35, %v1823_v18  ;;  %v886_v40 = vpop.f32.mrb[19].mxu0  ;;  %v605_v15 = vmul.f32 %v1400_v38, %v1847_v37  ;;  %v557_v41 = vpop.f32.mrb[13].mxu1  ;;  %v1035_v35 = vld [vmem:[%s2054_s2 + $0x48] sm:$0xff] }
 0x290   :  { %v941_v43 = vmul.f32 %v886_v40, %v1818_v17  ;;  %v604_v14 = vmul.f32 %v557_v41, %v1842_v36  ;;  %v1666_v38 = vpack.c.bf16 %v1035_v35, %v1034_v26  ;;  %v1037_v40 = vld [vmem:[%s2054_s2 + $0x58] sm:$0xff]  ;;  %v1038_v41 = vld [vmem:[%s2054_s2 + $0x60] sm:$0xff] }
 0x292   :  { %v1630_v47 = vpack.c.bf16 %v942_v39, %v941_v43  ;;  %v1598_v48 = vpack.c.bf16 %v605_v15, %v604_v14  ;;  %v1036_v39 = vld [vmem:[%s2054_s2 + $0x50] sm:$0xff]  ;;  %v1039_v43 = vld [vmem:[%s2054_s2 + $0x68] sm:$0xff] }
 0x293   :  { %v1670_v15 = vpack.c.bf16 %v1037_v40, %v1036_v39  ;;  %v1674_v14 = vpack.c.bf16 %v1039_v43, %v1038_v41 }
 0x294   :  { %1631 = vmatprep.subr.bf16.mxu0 %v1630_v47  ;;  %1599 = vmatprep.subr.bf16.mxu1 %v1598_v48 }
 0x295   :  { %1633 = vmatpush3.bf16.msra.mxu0 %v1630_v47  ;;  %1601 = vmatpush3.bf16.msra.mxu1 %v1598_v48  ;;  %v1040_v47 = vld [vmem:[%s2054_s2 + $0x70] sm:$0xff]  ;;  %v1041_v48 = vld [vmem:[%s2054_s2 + $0x78] sm:$0xff] }
 0x296   :  { %v1463_v49 = vpop.f32.mrb[20].mxu0  ;;  %v1403_v50 = vpop.f32.mrb[14].mxu1 }
 0x297   :  { %v944_v53 = vmul.f32 %v1463_v49, %v1847_v37  ;;  %v896_v54 = vpop.f32.mrb[21].mxu0  ;;  %v607_v18 = vmul.f32 %v1403_v50, %v1859_v45  ;;  %v567_v55 = vpop.f32.mrb[15].mxu1  ;;  %v1678_v49 = vpack.c.bf16 %v1041_v48, %v1040_v47 }
 0x298   :  { %v943_v56 = vmul.f32 %v896_v54, %v1842_v36  ;;  %v606_v17 = vmul.f32 %v567_v55, %v1854_v44  ;;  %v1217_v55 = vld [vmem:[%s2055_s3] ss:$0 sm:$0xff] }
 0x29a   :  { %v1634_v60 = vpack.c.bf16 %v944_v53, %v943_v56  ;;  %v1602_v30 = vpack.c.bf16 %v607_v18, %v606_v17 }
 0x29c   :  { %1635 = vmatprep.subr.bf16.mxu0 %v1634_v60  ;;  %1603 = vmatprep.subr.bf16.mxu1 %v1602_v30 }
 0x29d   :  { %1637 = vmatpush3.bf16.msra.mxu0 %v1634_v60  ;;  %1605 = vmatpush3.bf16.msra.mxu1 %v1602_v30 }
 0x29e   :  { %v1466_v61 = vpop.f32.mrb[22].mxu0  ;;  %v1406_v62 = vpop.f32.mrb[16].mxu1 }
 0x29f   :  { %v946_v37 = vmul.f32 %v1466_v61, %v1859_v45  ;;  %v906_v63 = vpop.f32.mrb[23].mxu0  ;;  %v609_v0 = vmul.f32 %v1406_v62, %v1871_v52  ;;  %v577_v59 = vpop.f32.mrb[17].mxu1 }
 0x2a0   :  { %v945_v36 = vmul.f32 %v906_v63, %v1854_v44  ;;  %v608_v1 = vmul.f32 %v577_v59, %v1866_v51  ;;  %v1026_v44 = vld [vmem:[%s2054_s2] sm:$0xff] }
 0x2a1   :  { %v1650_v21 = vpack.c.bf16 %v1027_v11, %v1026_v44 }
 0x2a2   :  { %v1638_v2 = vpack.c.bf16 %v946_v37, %v945_v36  ;;  %v1606_v3 = vpack.c.bf16 %v609_v0, %v608_v1 }
 0x2a4   :  { %1639 = vmatprep.subr.bf16.mxu0 %v1638_v2  ;;  %1607 = vmatprep.subr.bf16.mxu1 %v1606_v3 }
 0x2a5   :  { %1641 = vmatpush3.bf16.msra.mxu0 %v1638_v2  ;;  %1609 = vmatpush3.bf16.msra.mxu1 %v1606_v3 }
 0x2a6   :  { %v1409_v42 = vpop.f32.mrb[18].mxu1  ;;  %v1469_v22 = vpop.f32.mrb[24].mxu0 }
 0x2a7   :  { %v611_v45 = vmul.f32 %v1409_v42, %v1883_v58  ;;  %v948_v5 = vmul.f32 %v1469_v22, %v1871_v52  ;;  %v587_v6 = vpop.f32.mrb[19].mxu1  ;;  %v916_v7 = vpop.f32.mrb[25].mxu0  ;;  %v1028_v52 = vld [vmem:[%s2054_s2 + $0x10] sm:$0xff] }
 0x2a8   :  { %v610_v46 = vmul.f32 %v587_v6, %v1878_v57  ;;  %v947_v13 = vmul.f32 %v916_v7, %v1866_v51  ;;  %v1654_v51 = vpack.c.bf16 %v1029_v8, %v1028_v52 }
 0x2aa   :  { %v1610_v9 = vpack.c.bf16 %v611_v45, %v610_v46  ;;  %v1642_v19 = vpack.c.bf16 %v948_v5, %v947_v13 }
 0x2ac   :  { %1611 = vmatprep.subr.bf16.mxu1 %v1610_v9  ;;  %1643 = vmatprep.subr.bf16.mxu0 %v1642_v19 }
 0x2ad   :  { %1613 = vmatpush3.bf16.msra.mxu1 %v1610_v9  ;;  %1645 = vmatpush3.bf16.msra.mxu0 %v1642_v19 }
 0x2ae   :  { %v1472_v23 = vpop.f32.mrb[26].mxu0  ;;  %1651 = vmatprep.subr.bf16.mxu1 %v1650_v21 }
 0x2af   :  { %v950_v25 = vmul.f32 %v1472_v23, %v1883_v58  ;;  %v926_v27 = vpop.f32.mrb[27].mxu0  ;;  %v1032_v58 = vld [vmem:[%s2054_s2 + $0x30] sm:$0xff] }
 0x2b0   :  { %v949_v12 = vmul.f32 %v926_v27, %v1878_v57  ;;  %1443 = vmatmul.mubr.f32.vlgmr.msra.gmra.mrb[20].mxu1 %v344_v24  ;;  %v1662_v57 = vpack.c.bf16 %v1033_v33, %v1032_v58 }
 0x2b1   :  { %1653 = vmatpush3.bf16.msra.mxu1 %v1650_v21 }
 0x2b2   :  { %v1646_v32 = vpack.c.bf16 %v950_v25, %v949_v12  ;;  %1655 = vmatprep.subr.bf16.mxu1 %v1654_v51 }
 0x2b4   :  { %1647 = vmatprep.subr.bf16.mxu0 %v1646_v32 }
 0x2b5   :  { %1649 = vmatpush3.bf16.msra.mxu0 %v1646_v32  ;;  %1657 = vmatpush3.bf16.msra.mxu1 %v1654_v51 }
 0x2b6   :  { %1659 = vmatprep.subr.bf16.mxu1 %v1658_v10 }
 0x2b8   :  { %1506 = vmatmul.mubr.f32.vlgmr.msra.gmra.mrb[28].mxu0 %v346_v34 }
 0x2b9   :  { %1661 = vmatpush3.bf16.msra.mxu1 %v1658_v10 }
 0x2ba   :  { %1663 = vmatprep.subr.bf16.mxu1 %v1662_v57 }
 0x2bd   :  { %1665 = vmatpush3.bf16.msra.mxu1 %v1662_v57 }
 0x2be   :  { %1667 = vmatprep.subr.bf16.mxu1 %v1666_v38 }
 0x2c1   :  { %1669 = vmatpush3.bf16.msra.mxu1 %v1666_v38 }
 0x2c2   :  { %1671 = vmatprep.subr.bf16.mxu1 %v1670_v15 }
 0x2c5   :  { %1673 = vmatpush3.bf16.msra.mxu1 %v1670_v15 }
 0x2c6   :  { %1675 = vmatprep.subr.bf16.mxu1 %v1674_v14 }
 0x2c9   :  { %1677 = vmatpush3.bf16.msra.mxu1 %v1674_v14 }
 0x2ca   :  { %1679 = vmatprep.subr.bf16.mxu1 %v1678_v49 }
 0x2cd   :  { %1681 = vmatpush3.bf16.msra.mxu1 %v1678_v49 }
 0x383   :  { %v1444_v50 = vpop.f32.mrb[20].mxu1 }
 0x384   :  { %v678_v53 = vpop.f32.mrb[21].mxu1 }
 0x385   :  { %1540 = vmatprep.mubr.f32.mxu1 %v678_v53 }
 0x386   :  { %1541 = vmatmul.mubr.f32.vlgmr.msra.gmra.mrb[22].mxu1 %v1444_v50 }
 0x38b   :  { %v1507_v54 = vpop.f32.mrb[28].mxu0 }
 0x38c   :  { %v1017_v18 = vpop.f32.mrb[29].mxu0 }
 0x38d   :  { %1543 = vmatprep.mubr.f32.mxu1 %v1017_v18 }
 0x38e   :  { %1544 = vmatmul.mubr.f32.gmra.mrb[24].mxu1 %v1507_v54 }
 0x459   :  { %v1542_v56 = vpop.f32.mrb[22].mxu1 }
 0x45a   :  { %v1119_v17 = vadd.f32 %v1542_v56, %v1217_v55  ;;  %v1113_v60 = vpop.f32.mrb[23].mxu1 }
 0x45b   :  { %v1114_v30 = vadd.f32 %v1217_v55, %v1113_v60 }
 0x45c   :  { %v1133_v61 = vmul.f32 %v1119_v17, %v1119_v17 }
 0x45d   :  { %v1132_v62 = vmul.f32 %v1114_v30, %v1114_v30 }
 0x45e   :  { %v1139_v37 = vsel %vm27_vm0, %v1133_v61, 0.0 }
 0x45f   :  { %1140 = vadd.xlane.f32.xlu1 %v1139_v37  ;;  %v1136_v63 = vsel %vm27_vm0, %v1132_v62, 0.0 }
 0x460   :  { %1137 = vadd.xlane.f32.xlu0 %v1136_v63 }
 0x461   :  { %v1545_v0 = vpop.f32.mrb[24].mxu1 }
 0x462   :  { %v1129_v59 = vadd.f32 %v1545_v0, %v1217_v55  ;;  %v1123_v36 = vpop.f32.mrb[25].mxu1 }
 0x463   :  { %v1124_v1 = vadd.f32 %v1217_v55, %v1123_v36 }
 0x464   :  { %v1135_v2 = vmul.f32 %v1129_v59, %v1129_v59 }
 0x465   :  { %v1134_v3 = vmul.f32 %v1124_v1, %v1124_v1 }
 0x466   :  { %v1145_v42 = vsel %vm27_vm0, %v1135_v2, 0.0 }
 0x467   :  { %1146 = vadd.xlane.f32.xlu1 %v1145_v42  ;;  %v1142_v22 = vsel %vm27_vm0, %v1134_v3, 0.0 }
 0x468   :  { %1143 = vadd.xlane.f32.xlu0 %v1142_v22 }
 0x4ec   :  { %v1141_v4 = vpop.xlane.xlu1 %1140 }
 0x4ed   :  { %v1149_v45 = vmax.f32 %v1141_v4, 1e-24  ;;  %v1138_v5 = vpop.xlane.xlu0 %1137 }
 0x4ee   :  { %v1148_v6 = vmax.f32 %v1138_v5, 1e-24 }
 0x4ef   :  { %1711 = vrsqrt.f32 %v1149_v45 }
 0x4f0   :  { %1713 = vrsqrt.f32 %v1148_v6 }
 0x4f4   :  { %v1147_v7 = vpop.xlane.xlu1 %1146 }
 0x4f5   :  { %v1151_v44 = vmax.f32 %v1147_v7, 1e-24  ;;  %v1144_v11 = vpop.xlane.xlu0 %1143 }
 0x4f6   :  { %v1150_v46 = vmax.f32 %v1144_v11, 1e-24 }
 0x4f7   :  { %1715 = vrsqrt.f32 %v1151_v44 }
 0x4f8   :  { %1717 = vrsqrt.f32 %v1150_v46 }
 0x4f9   :  { %v1712_v13 = vpop.eup %1711 }
 0x4fa   :  { %v1714_v9 = vpop.eup %1713  ;;  %v1157_v19 = vmul.f32 %v1712_v13, %v1119_v17 }
 0x4fb   :  { %v1156_v21 = vmul.f32 %v1714_v9, %v1114_v30 }
 0x4fc   :  { %v1166_v52 = vmul.f32 %v1218_v16, %v1157_v19 }
 0x4fd   :  { %v1165_v8 = vmul.f32 %v1218_v16, %v1156_v21 }
 0x4fe   :  { %1170 = vst.msk [vmem:[%s2056_s5 + $0x8] sm:$0xff] %vm27_vm0, %v1166_v52 }
 0x4ff   :  { %1169 = vst.msk [vmem:[%s2056_s5] sm:$0xff] %vm27_vm0, %v1165_v8 }
 0x501   :  { %v1716_v23 = vpop.eup %1715 }
 0x502   :  { %v1718_v24 = vpop.eup %1717  ;;  %v1159_v51 = vmul.f32 %v1716_v23, %v1129_v59 }
 0x503   :  { %v1158_v20 = vmul.f32 %v1718_v24, %v1124_v1 }
 0x504   :  { %v1168_v25 = vmul.f32 %v1218_v16, %v1159_v51 }
 0x505   :  { %v1167_v27 = vmul.f32 %v1218_v16, %v1158_v20 }
 0x506   :  { %1172 = vst.msk [vmem:[%s2056_s5 + $0x18] sm:$0xff] %vm27_vm0, %v1168_v25 }
 0x507   :  { %1171 = vst.msk [vmem:[%s2056_s5 + $0x10] sm:$0xff] %vm27_vm0, %v1167_v27 }

</bundles_post_ra>
